<compile_context>
chip_gen: v7x
topology: tpu7x:2x2x1
jax: 0.10.0
libtpu: 0.0.40
codegen_flags: <defaults>
</compile_context>

<pallas_src>
import functools

import jax
import jax.numpy as jnp
from jax.experimental import pallas as pl
from jax.experimental.pallas import tpu as pltpu

BN_EPS = 1e-5
LANE = 128
SUB = 16  # sublane rounding valid for both f32 (8) and bf16 (16) packing


def _round_up(x, m):
    return (x + m - 1) // m * m


# --------------------------------------------------------------------------
# Kernel
# --------------------------------------------------------------------------
def _head_kernel(x_ref, w1_ref, b1_ref, w2_ref, b2_ref, o_ref, *, approximate_gelu):
    # x_ref : [tile_b, H]    f32/bf16  (CLS rows only)
    # w1_ref: [H, F]         bf16      (BatchNorm folded in)
    # b1_ref: [1, F]         f32       (BatchNorm folded in)
    # w2_ref: [F, Lpad]      bf16      (zero-padded to a 128-lane multiple)
    # b2_ref: [1, Lpad]      f32
    # o_ref : [tile_b, Lpad] bf16
    x = x_ref[...].astype(jnp.bfloat16)  # no-op if features are already bf16

    # dense (+ folded eval-mode BatchNorm): bf16 MXU matmul, f32 accumulation.
    h = jnp.dot(x, w1_ref[...], preferred_element_type=jnp.float32) + b1_ref[...]

    if approximate_gelu:
        # tanh GELU routes the transcendental to the EUP slot (off the VALU
        # critical path). Opt-in only: torch.nn.GELU() default is exact erf.
        h = jax.nn.gelu(h, approximate=True)
    else:
        # exact erf GELU (matches torch.nn.GELU() default), kept in f32.
        h = 0.5 * h * (1.0 + jax.lax.erf(h * 0.7071067811865476))

    # out_proj: bf16 MXU matmul, f32 accumulation; lane-dense bf16 padded output.
    o_ref[...] = (
        jnp.dot(h.astype(jnp.bfloat16), w2_ref[...],
                preferred_element_type=jnp.float32)
        + b2_ref[...]
    ).astype(o_ref.dtype)


# --------------------------------------------------------------------------
# Parameter prep: fold eval-mode BatchNorm, cast matmul weights to bf16,
# zero-pad out_proj to a lane-dense (multiple-of-128) width.
# --------------------------------------------------------------------------
def prepare_params(params):
    scale = params["gamma"] * jax.lax.rsqrt(params["var"] + BN_EPS)          # [1, F]
    w1 = (params["w1"] * scale).astype(jnp.bfloat16)                         # [H, F]
    b1 = ((params["b1"] - params["mean"]) * scale
          + params["beta"]).astype(jnp.float32)                              # [1, F]

    num_labels = params["w2"].shape[1]
    l_pad = _round_up(num_labels, LANE)
    w2 = jnp.pad(params["w2"], ((0, 0), (0, l_pad - num_labels))).astype(jnp.bfloat16)
    b2 = jnp.pad(params["b2"], ((0, 0), (0, l_pad - num_labels))).astype(jnp.float32)
    return {"w1": w1, "b1": b1, "w2": w2, "b2": b2, "num_labels": num_labels}


# --------------------------------------------------------------------------
# Tiling / chip-shape helpers
# --------------------------------------------------------------------------
def _device_kind():
    try:
        return jax.devices()[0].device_kind.lower()
    except Exception:
        return ""


def _default_min_steps():
    # v7x has 2 TensorCores per chip: keep >=2 grid steps so both stay busy.
    # v5e/v6e have a single TC where the grid is a pure serial loop -> 1 step.
    return 2 if "v7" in _device_kind() else 1


def _dim_semantics(n_steps):
    if n_steps <= 1:
        return ("arbitrary",)
    if "v7" in _device_kind():
        # Only CORE_PARALLEL-class semantics actually shard the axis across cores.
        return (pltpu.CORE_PARALLEL,)
    return ("parallel",)


def _choose_tiling(batch, hidden, feat, l_pad, x_itemsize, out_itemsize,
                   min_steps, vmem_budget):
    """Fewest near-equal batch tiles (multiples of SUB) that fit the VMEM budget."""
    b_r = _round_up(batch, SUB)
    # Worst-case weight footprint (double-buffered) — conservative even when the
    # single-buffer request is honored.
    w_bytes = ((hidden * feat + feat * l_pad) * 2 + (feat + l_pad) * 4) * 2
    n = max(1, min_steps)
    while True:
        tile_b = _round_up(pl.cdiv(b_r, n), SUB)
        est = (tile_b * hidden * x_itemsize * 2        # x tile, double-buffered
               + w_bytes                                # weights
               + tile_b * feat * 4                      # f32 GELU intermediate
               + tile_b * l_pad * out_itemsize * 2)     # output tile, double-buffered
        if est <= vmem_budget or tile_b <= SUB:
            return tile_b, pl.cdiv(b_r, tile_b)
        n += 1


# --------------------------------------------------------------------------
# Wrapper
# --------------------------------------------------------------------------
def roberta_classification_head(features, folded, *, min_steps=None,
                                approximate_gelu=False,
                                vmem_budget_bytes=26 * 1024 * 1024):
    """features: [B, S, H] f32 or bf16. Returns logits [B, num_labels] f32."""
    B, S, H = features.shape
    w1, b1, w2, b2 = folded["w1"], folded["b1"], folded["w2"], folded["b2"]
    F = w1.shape[1]
    l_pad = w2.shape[1]
    num_labels = folded["num_labels"]
    x_itemsize = jnp.dtype(features.dtype).itemsize
    out_itemsize = 2  # bf16 padded logits block

    if min_steps is None:
        min_steps = _default_min_steps()
    tile_b, n_steps = _choose_tiling(B, H, F, l_pad, x_itemsize, out_itemsize,
                                     min_steps, vmem_budget_bytes)
    b_pad = tile_b * n_steps

    # Fuse the CLS-token slice into the kernel's DMA: a free row-major reshape
    # to [B, S*H] makes columns [0:H) exactly features[:, 0, :], so the x
    # BlockSpec reads only the CLS rows straight from HBM.
    if H % LANE == 0 or S == 1:
        x2 = features.reshape(B, S * H)
    else:
        # TODO(synk): lane-unaligned hidden sizes fall back to a wrapper-side
        # CLS slice (extra HBM round trip) to satisfy the (8,128) block rule.
        x2 = features[:, 0, :]
    if b_pad != B:
        x2 = jnp.pad(x2, ((0, b_pad - B), (0, 0)))

    cost = pl.CostEstimate(
        flops=2 * b_pad * H * F + 2 * b_pad * F * l_pad,
        transcendentals=b_pad * F,
        bytes_accessed=(b_pad * H * x_itemsize
                        + (H * F + F * l_pad) * 2 + (F + l_pad) * 4
                        + b_pad * l_pad * out_itemsize),
    )

    kernel = functools.partial(_head_kernel, approximate_gelu=approximate_gelu)

    def run(single_buffer_weights):
        # Constant-index operands are DMA'd once; single-buffer them to halve
        # their VMEM footprint (headroom for larger batch tiles, esp. on v7x).
        wmode = ({"pipeline_mode": pl.Buffered(1)}
                 if single_buffer_weights else {})
        return pl.pallas_call(
            kernel,
            out_shape=jax.ShapeDtypeStruct((b_pad, l_pad), jnp.bfloat16),
            grid_spec=pltpu.PrefetchScalarGridSpec(
                num_scalar_prefetch=0,
                grid=(n_steps,),
                in_specs=[
                    pl.BlockSpec((tile_b, H), lambda i: (i, 0)),           # CLS rows
                    pl.BlockSpec((H, F), lambda i: (0, 0), **wmode),       # VMEM-resident weights
                    pl.BlockSpec((1, F), lambda i: (0, 0), **wmode),
                    pl.BlockSpec((F, l_pad), lambda i: (0, 0), **wmode),
                    pl.BlockSpec((1, l_pad), lambda i: (0, 0), **wmode),
                ],
                out_specs=pl.BlockSpec((tile_b, l_pad), lambda i: (i, 0)),
            ),
            compiler_params=pltpu.CompilerParams(
                dimension_semantics=_dim_semantics(n_steps),
                # Above v5e's 16 MiB default scoped VMEM, inside every gen's
                # physical VMEM (incl. v7x's 64 MiB); tiling budget is 26 MiB.
                vmem_limit_bytes=32 * 1024 * 1024,
            ),
            cost_estimate=cost,
        )(x2, w1, b1, w2, b2)

    try:
        out = run(True)
    except Exception:
        # TODO(synk): pl.Buffered(1) rejected by this jax build — fall back to
        # default double-buffering of the constant weight operands.
        out = run(False)

    return out[:B, :num_labels].astype(jnp.float32)


# --------------------------------------------------------------------------
# Synthetic parameters + pure-JAX reference
# --------------------------------------------------------------------------
def make_params(key, hidden_size, out_features, num_labels):
    """Deterministic synthetic parameters (shapes from the module __init__)."""
    k1, k2, k3, k4, k5, k6, k7, k8 = jax.random.split(key, 8)
    return {
        # dense: Linear(hidden_size, out_features) -> weight stored as [H, F]
        "w1": jax.random.normal(k1, (hidden_size, out_features), jnp.float32) * 0.02,
        "b1": jax.random.normal(k2, (1, out_features), jnp.float32) * 0.02,
        # batchnorm1: BatchNorm1d(out_features) — weight/bias + running stats
        "gamma": 1.0 + 0.1 * jax.random.normal(k3, (1, out_features), jnp.float32),
        "beta": 0.1 * jax.random.normal(k4, (1, out_features), jnp.float32),
        "mean": 0.05 * jax.random.normal(k5, (1, out_features), jnp.float32),
        "var": jnp.abs(1.0 + 0.1 * jax.random.normal(k6, (1, out_features), jnp.float32)),
        # out_proj: Linear(out_features, num_labels) -> weight stored as [F, L]
        "w2": jax.random.normal(k7, (out_features, num_labels), jnp.float32) * 0.02,
        "b2": jax.random.normal(k8, (1, num_labels), jnp.float32) * 0.02,
    }


def _reference(features, p):
    """Pure-JAX f32 reference matching the PyTorch module (eval mode)."""
    x = features[:, 0, :]
    h = x @ p["w1"] + p["b1"]
    h = (h - p["mean"]) * jax.lax.rsqrt(p["var"] + BN_EPS) * p["gamma"] + p["beta"]
    h = 0.5 * h * (1.0 + jax.lax.erf(h / jnp.sqrt(2.0)))
    return h @ p["w2"] + p["b2"]


if __name__ == "__main__":
    # Small but TPU-aligned demo shapes (hidden/out_features multiples of 128 so
    # the fused-CLS BlockSpec path is exercised). Production shapes
    # (B >= 128, hidden in {768, 1024}) use the same code path with a larger /
    # multi-step batch tiling chosen automatically.
    B, S, H, F, L = 8, 8, 128, 256, 3

    key = jax.random.PRNGKey(0)
    k_feat, k_par = jax.random.split(key)
    features = jax.random.normal(k_feat, (B, S, H), jnp.float32)
    params = make_params(k_par, H, F, L)
    folded = prepare_params(params)

    logits = roberta_classification_head(features, folded)
    logits = jax.block_until_ready(logits)

    ref = _reference(features, params)
    assert logits.shape == (B, L)
    # bf16 MXU operands + bf16 padded writeback (f32 accumulation) -> slightly
    # looser tolerance than pure f32.
    diff = float(jnp.max(jnp.abs(logits - ref)))
    assert jnp.allclose(logits, ref, atol=1e-2, rtol=1e-2), \
        f"mismatch vs reference (max|diff|={diff})"

    print("KERNEL_OK")
</pallas_src>

<mosaic_0001>
module attributes {stable_mosaic.version = 11 : i64} {
  func.func @_head_kernel(%arg0: i32, %arg1: memref<16x128xf32, #tpu.memory_space<vmem>>, %arg2: memref<128x256xbf16, #tpu.memory_space<vmem>>, %arg3: memref<1x256xf32, #tpu.memory_space<vmem>>, %arg4: memref<256x128xbf16, #tpu.memory_space<vmem>>, %arg5: memref<1x128xf32, #tpu.memory_space<vmem>>, %arg6: memref<16x128xbf16, #tpu.memory_space<vmem>>) attributes {dimension_semantics = [#tpu.dimension_semantics<arbitrary>], iteration_bounds = array<i64: 1>, scalar_prefetch = 0 : i64, scratch_operands = 0 : i64, tpu.core_type = #tpu.core_type<tc>, window_params = [{transform_indices = @transform_0, window_bounds = array<i64: 16, 128>}, {pipeline_mode = #tpu.pipeline_mode<synchronous>, transform_indices = @transform_1, window_bounds = array<i64: 128, 256>}, {pipeline_mode = #tpu.pipeline_mode<synchronous>, transform_indices = @transform_2, window_bounds = array<i64: 1, 256>}, {pipeline_mode = #tpu.pipeline_mode<synchronous>, transform_indices = @transform_3, window_bounds = array<i64: 256, 128>}, {pipeline_mode = #tpu.pipeline_mode<synchronous>, transform_indices = @transform_4, window_bounds = array<i64: 1, 128>}, {transform_indices = @transform_5, window_bounds = array<i64: 16, 128>}]} {
    %c0 = arith.constant 0 : index
    %c0_0 = arith.constant 0 : index
    %0 = vector.load %arg1[%c0, %c0_0] : memref<16x128xf32, #tpu.memory_space<vmem>>, vector<16x128xf32>
    %1 = arith.truncf %0 : vector<16x128xf32> to vector<16x128xbf16>
    %c0_1 = arith.constant 0 : index
    %c0_2 = arith.constant 0 : index
    %2 = vector.load %arg2[%c0_1, %c0_2] : memref<128x256xbf16, #tpu.memory_space<vmem>>, vector<128x256xbf16>
    %cst = arith.constant dense<0.000000e+00> : vector<16x256xf32>
    %3 = tpu.matmul %1, %2, %cst {dimension_numbers = #tpu.dot_dimension_numbers<[1], [0], [0], [1], [0, 0, 1, 1], [], []>} : vector<16x128xbf16>, vector<128x256xbf16>, vector<16x256xf32> -> vector<16x256xf32>
    %c0_3 = arith.constant 0 : index
    %c0_4 = arith.constant 0 : index
    %4 = vector.load %arg3[%c0_3, %c0_4] : memref<1x256xf32, #tpu.memory_space<vmem>>, vector<1x256xf32>
    %5 = vector.broadcast %4 : vector<1x256xf32> to vector<16x256xf32>
    %6 = arith.addf %3, %5 : vector<16x256xf32>
    %cst_5 = arith.constant 5.000000e-01 : f32
    %7 = vector.broadcast %cst_5 : f32 to vector<16x256xf32>
    %8 = arith.mulf %7, %6 : vector<16x256xf32>
    %cst_6 = arith.constant 0.707106769 : f32
    %9 = vector.broadcast %cst_6 : f32 to vector<16x256xf32>
    %10 = arith.mulf %6, %9 : vector<16x256xf32>
    %11 = math.erf %10 : vector<16x256xf32>
    %cst_7 = arith.constant 1.000000e+00 : f32
    %12 = vector.broadcast %cst_7 : f32 to vector<16x256xf32>
    %13 = arith.addf %12, %11 : vector<16x256xf32>
    %14 = arith.mulf %8, %13 : vector<16x256xf32>
    %15 = arith.truncf %14 : vector<16x256xf32> to vector<16x256xbf16>
    %c0_8 = arith.constant 0 : index
    %c0_9 = arith.constant 0 : index
    %16 = vector.load %arg4[%c0_8, %c0_9] : memref<256x128xbf16, #tpu.memory_space<vmem>>, vector<256x128xbf16>
    %cst_10 = arith.constant dense<0.000000e+00> : vector<16x128xf32>
    %17 = tpu.matmul %15, %16, %cst_10 {dimension_numbers = #tpu.dot_dimension_numbers<[1], [0], [0], [1], [0, 0, 1, 1], [], []>} : vector<16x256xbf16>, vector<256x128xbf16>, vector<16x128xf32> -> vector<16x128xf32>
    %c0_11 = arith.constant 0 : index
    %c0_12 = arith.constant 0 : index
    %18 = vector.load %arg5[%c0_11, %c0_12] : memref<1x128xf32, #tpu.memory_space<vmem>>, vector<1x128xf32>
    %19 = vector.broadcast %18 : vector<1x128xf32> to vector<16x128xf32>
    %20 = arith.addf %17, %19 : vector<16x128xf32>
    %21 = arith.truncf %20 : vector<16x128xf32> to vector<16x128xbf16>
    %c0_13 = arith.constant 0 : index
    %c0_14 = arith.constant 0 : index
    %22 = vector.load %arg6[%c0_13, %c0_14] : memref<16x128xbf16, #tpu.memory_space<vmem>>, vector<16x128xbf16>
    tpu.vector_store %arg6[%c0_13, %c0_14], %21 {strides = array<i32>} : memref<16x128xbf16, #tpu.memory_space<vmem>>, vector<16x128xbf16>,
    return
  }
  func.func @transform_0(%arg0: i32) -> (i32, i32) {
    %c0_i32 = arith.constant 0 : i32
    %c0_i32_0 = arith.constant 0 : i32
    return %arg0, %c0_i32 : i32, i32
  }
  func.func @transform_1(%arg0: i32) -> (i32, i32) {
    %c0_i32 = arith.constant 0 : i32
    %c0_i32_0 = arith.constant 0 : i32
    %c0_i32_1 = arith.constant 0 : i32
    return %c0_i32, %c0_i32_0 : i32, i32
  }
  func.func @transform_2(%arg0: i32) -> (i32, i32) {
    %c0_i32 = arith.constant 0 : i32
    %c0_i32_0 = arith.constant 0 : i32
    %c0_i32_1 = arith.constant 0 : i32
    return %c0_i32, %c0_i32_0 : i32, i32
  }
  func.func @transform_3(%arg0: i32) -> (i32, i32) {
    %c0_i32 = arith.constant 0 : i32
    %c0_i32_0 = arith.constant 0 : i32
    %c0_i32_1 = arith.constant 0 : i32
    return %c0_i32, %c0_i32_0 : i32, i32
  }
  func.func @transform_4(%arg0: i32) -> (i32, i32) {
    %c0_i32 = arith.constant 0 : i32
    %c0_i32_0 = arith.constant 0 : i32
    %c0_i32_1 = arith.constant 0 : i32
    return %c0_i32, %c0_i32_0 : i32, i32
  }
  func.func @transform_5(%arg0: i32) -> (i32, i32) {
    %c0_i32 = arith.constant 0 : i32
    %c0_i32_0 = arith.constant 0 : i32
    return %arg0, %c0_i32 : i32, i32
  }
}

module attributes {stable_mosaic.version = 11 : i64} {
  func.func @_head_kernel(%arg0: i32, %arg1: memref<16x128xf32, #tpu.memory_space<vmem>>, %arg2: memref<128x256xbf16, #tpu.memory_space<vmem>>, %arg3: memref<1x256xf32, #tpu.memory_space<vmem>>, %arg4: memref<256x128xbf16, #tpu.memory_space<vmem>>, %arg5: memref<1x128xf32, #tpu.memory_space<vmem>>, %arg6: memref<16x128xbf16, #tpu.memory_space<vmem>>) attributes {dimension_semantics = [#tpu.dimension_semantics<arbitrary>], iteration_bounds = array<i64: 1>, scalar_prefetch = 0 : i64, scratch_operands = 0 : i64, tpu.core_type = #tpu.core_type<tc>, window_params = [{transform_indices = @transform_0, window_bounds = array<i64: 16, 128>}, {pipeline_mode = #tpu.pipeline_mode<synchronous>, transform_indices = @transform_1, window_bounds = array<i64: 128, 256>}, {pipeline_mode = #tpu.pipeline_mode<synchronous>, transform_indices = @transform_2, window_bounds = array<i64: 1, 256>}, {pipeline_mode = #tpu.pipeline_mode<synchronous>, transform_indices = @transform_3, window_bounds = array<i64: 256, 128>}, {pipeline_mode = #tpu.pipeline_mode<synchronous>, transform_indices = @transform_4, window_bounds = array<i64: 1, 128>}, {transform_indices = @transform_5, window_bounds = array<i64: 16, 128>}]} {
    %c0 = arith.constant 0 : index
    %c0_0 = arith.constant 0 : index
    %0 = vector.load %arg1[%c0, %c0_0] : memref<16x128xf32, #tpu.memory_space<vmem>>, vector<16x128xf32>
    %1 = arith.truncf %0 : vector<16x128xf32> to vector<16x128xbf16>
    %c0_1 = arith.constant 0 : index
    %c0_2 = arith.constant 0 : index
    %2 = vector.load %arg2[%c0_1, %c0_2] : memref<128x256xbf16, #tpu.memory_space<vmem>>, vector<128x256xbf16>
    %cst = arith.constant dense<0.000000e+00> : vector<16x256xf32>
    %3 = tpu.matmul %1, %2, %cst {dimension_numbers = #tpu.dot_dimension_numbers<[1], [0], [0], [1], [0, 0, 1, 1], [], []>} : vector<16x128xbf16>, vector<128x256xbf16>, vector<16x256xf32> -> vector<16x256xf32>
    %c0_3 = arith.constant 0 : index
    %c0_4 = arith.constant 0 : index
    %4 = vector.load %arg3[%c0_3, %c0_4] : memref<1x256xf32, #tpu.memory_space<vmem>>, vector<1x256xf32>
    %5 = vector.broadcast %4 : vector<1x256xf32> to vector<16x256xf32>
    %6 = arith.addf %3, %5 : vector<16x256xf32>
    %cst_5 = arith.constant 5.000000e-01 : f32
    %7 = vector.broadcast %cst_5 : f32 to vector<16x256xf32>
    %8 = arith.mulf %7, %6 : vector<16x256xf32>
    %cst_6 = arith.constant 0.707106769 : f32
    %9 = vector.broadcast %cst_6 : f32 to vector<16x256xf32>
    %10 = arith.mulf %6, %9 : vector<16x256xf32>
    %11 = math.erf %10 : vector<16x256xf32>
    %cst_7 = arith.constant 1.000000e+00 : f32
    %12 = vector.broadcast %cst_7 : f32 to vector<16x256xf32>
    %13 = arith.addf %12, %11 : vector<16x256xf32>
    %14 = arith.mulf %8, %13 : vector<16x256xf32>
    %15 = arith.truncf %14 : vector<16x256xf32> to vector<16x256xbf16>
    %c0_8 = arith.constant 0 : index
    %c0_9 = arith.constant 0 : index
    %16 = vector.load %arg4[%c0_8, %c0_9] : memref<256x128xbf16, #tpu.memory_space<vmem>>, vector<256x128xbf16>
    %cst_10 = arith.constant dense<0.000000e+00> : vector<16x128xf32>
    %17 = tpu.matmul %15, %16, %cst_10 {dimension_numbers = #tpu.dot_dimension_numbers<[1], [0], [0], [1], [0, 0, 1, 1], [], []>} : vector<16x256xbf16>, vector<256x128xbf16>, vector<16x128xf32> -> vector<16x128xf32>
    %c0_11 = arith.constant 0 : index
    %c0_12 = arith.constant 0 : index
    %18 = vector.load %arg5[%c0_11, %c0_12] : memref<1x128xf32, #tpu.memory_space<vmem>>, vector<1x128xf32>
    %19 = vector.broadcast %18 : vector<1x128xf32> to vector<16x128xf32>
    %20 = arith.addf %17, %19 : vector<16x128xf32>
    %21 = arith.truncf %20 : vector<16x128xf32> to vector<16x128xbf16>
    %c0_13 = arith.constant 0 : index
    %c0_14 = arith.constant 0 : index
    %22 = vector.load %arg6[%c0_13, %c0_14] : memref<16x128xbf16, #tpu.memory_space<vmem>>, vector<16x128xbf16>
    tpu.vector_store %arg6[%c0_13, %c0_14], %21 {strides = array<i32>} : memref<16x128xbf16, #tpu.memory_space<vmem>>, vector<16x128xbf16>,
    return
  }
  func.func @transform_0(%arg0: i32) -> (i32, i32) {
    %c0_i32 = arith.constant 0 : i32
    %c0_i32_0 = arith.constant 0 : i32
    return %arg0, %c0_i32 : i32, i32
  }
  func.func @transform_1(%arg0: i32) -> (i32, i32) {
    %c0_i32 = arith.constant 0 : i32
    %c0_i32_0 = arith.constant 0 : i32
    %c0_i32_1 = arith.constant 0 : i32
    return %c0_i32, %c0_i32_0 : i32, i32
  }
  func.func @transform_2(%arg0: i32) -> (i32, i32) {
    %c0_i32 = arith.constant 0 : i32
    %c0_i32_0 = arith.constant 0 : i32
    %c0_i32_1 = arith.constant 0 : i32
    return %c0_i32, %c0_i32_0 : i32, i32
  }
  func.func @transform_3(%arg0: i32) -> (i32, i32) {
    %c0_i32 = arith.constant 0 : i32
    %c0_i32_0 = arith.constant 0 : i32
    %c0_i32_1 = arith.constant 0 : i32
    return %c0_i32, %c0_i32_0 : i32, i32
  }
  func.func @transform_4(%arg0: i32) -> (i32, i32) {
    %c0_i32 = arith.constant 0 : i32
    %c0_i32_0 = arith.constant 0 : i32
    %c0_i32_1 = arith.constant 0 : i32
    return %c0_i32, %c0_i32_0 : i32, i32
  }
  func.func @transform_5(%arg0: i32) -> (i32, i32) {
    %c0_i32 = arith.constant 0 : i32
    %c0_i32_0 = arith.constant 0 : i32
    return %arg0, %c0_i32 : i32, i32
  }
}

</mosaic_0001>

<bundles_post_ra>
// kernel: tpu_custom_call.1
= control target key start
LH: loop header
LB: loop body
LE: loop exit
PB: predicated region body
PF: predicated region fallthrough
CT: control target
= control target key end

     0   :  { %10 = vsyncpa [#allocation3], 0  ;;  %s769_s0 = inlined_call_operand.hbm [shape: f32[16,1024], index: 0, kind: input, shape index: {}]   ;;  %s770_s1 = inlined_call_operand.hbm [shape: bf16[128,256], index: 1, kind: input, shape index: {}]   ;;  %s771_s2 = inlined_call_operand.vmem [shape: f32[1,256], index: 2, kind: input, shape index: {}]   ;;  %s772_s3 = inlined_call_operand.hbm [shape: bf16[256,128], index: 3, kind: input, shape index: {}]   ;;  %s773_s4 = inlined_call_operand.vmem [shape: f32[1,128], index: 4, kind: input, shape index: {}]   ;;  %s774_s5 = inlined_call_operand.hbm [shape: bf16[16,128], index: 5, kind: output, shape index: {}]  }
   0x1   :  { %11 = vsyncpa [#allocation6], 0 }
   0x2   :  { %12 = vsyncpa [#allocation4], 0  ;;  %s659_s18 = smov [#allocation5]   ;;  %s660_s20 = smov [#allocation2]  }
   0x3   :  { %s30_s19 = sshll.u32 %s659_s18, 4  ;;  %s18_s21 = sshll.u32 %s660_s20, 4  ;;  %s31_s19 = int_to_ptr.vmem [resolvable:$true] %s30_s19  ;;  %s699_s21 = int_to_ptr.vmem [resolvable:$true] %s18_s21 }
   0x4   :  { %s565_s24 = scalar_lea.hbm %s770_s1, 2048 }
   0x5   :  { %p566_p0 = scmp.ne.s32.totalorder %s770_s1, %s565_s24  ;;  %p569_p1 = scmp.lt.u32.totalorder %s565_s24, %s770_s1 }
   0x7   :  { %p571_p2 = pnand %p569_p1, %p566_p0 }
   0x9   :  { %574 = shalt.err (!%p571_p2)
}
   0xa   :  { %s575_s29 = scalar_lea.vmem %s31_s19, 2048  ;;  %p580_p4 = scmp.lt.s32.totalorder %s31_s19, %s31_s19 }
   0xb   :  { %p576_p3 = scmp.ne.s32.totalorder %s31_s19, %s575_s29  ;;  %p581_p5 = scmp.lt.s32.totalorder %s575_s29, %s575_s29 }
   0xd   :  { %p582_p6 = por %p581_p5, %p580_p4 }
   0xf   :  { %p583_p7 = pnand %p582_p6, %p576_p3 }
  0x11   :  { %586 = shalt.err (!%p583_p7)
}
  0x12   :  { %s661_s30 = smov 128   ;;  %s662_s6 = smov 8  }
  0x13   :  { %36 = dma.hbm_to_vmem [thread:$0]  %s770_s1, 2048, %s31_s19, [#allocation6], %s661_s30, %s661_s30, %s662_s6  }
  0x14   :  { %s587_s11 = scalar_lea.hbm %s769_s0, 256  ;;  %s589_s16 = scalar_lea.hbm %s769_s0, 2048 }
  0x15   :  { %p588_p8 = scmp.ne.s32.totalorder %s769_s0, %s587_s11  ;;  %p590_p9 = scmp.lt.u32.totalorder %s589_s16, %s587_s11 }
  0x16   :  { %p591_p10 = scmp.lt.u32.totalorder %s587_s11, %s769_s0 }
  0x18   :  { %p592_p11 = por %p591_p10, %p590_p9 }
  0x1a   :  { %p593_p12 = pnand %p592_p11, %p588_p8 }
  0x1c   :  { %596 = shalt.err (!%p593_p12)
}
  0x1d   :  { %s597_s1 = scalar_lea.vmem %s699_s21, 256  ;;  %p602_p0 = scmp.lt.s32.totalorder %s699_s21, %s699_s21 }
  0x1e   :  { %p598_p13 = scmp.ne.s32.totalorder %s699_s21, %s597_s1  ;;  %p603_p1 = scmp.lt.s32.totalorder %s597_s1, %s597_s1 }
  0x20   :  { %p604_p2 = por %p603_p1, %p602_p0 }
  0x22   :  { %p605_p3 = pnand %p604_p2, %p598_p13 }
  0x24   :  { %608 = shalt.err (!%p605_p3)
}
  0x25   :  { %s663_s19 = smov 1024   ;;  %s664_s23 = smov [#allocation7]  }
  0x26   :  { %24 = dma.hbm_to_vmem [thread:$0]  %s769_s0, 256, %s699_s21, [#allocation3], %s663_s19, %s661_s30, %s662_s6  }
  0x27   :  { %s44_s24 = sshll.u32 %s664_s23, 4  ;;  %s609_s27 = scalar_lea.hbm %s772_s3, 2048  ;;  %s45_s24 = int_to_ptr.vmem [resolvable:$true] %s44_s24 }
  0x28   :  { %p610_p4 = scmp.ne.s32.totalorder %s772_s3, %s609_s27  ;;  %p613_p5 = scmp.lt.u32.totalorder %s609_s27, %s772_s3 }
  0x2a   :  { %p615_p6 = pnand %p613_p5, %p610_p4 }
  0x2c   :  { %618 = shalt.err (!%p615_p6)
}
  0x2d   :  { %s619_s9 = scalar_lea.vmem %s45_s24, 2048  ;;  %p624_p8 = scmp.lt.s32.totalorder %s45_s24, %s45_s24 }
  0x2e   :  { %p620_p7 = scmp.ne.s32.totalorder %s45_s24, %s619_s9  ;;  %p625_p9 = scmp.lt.s32.totalorder %s619_s9, %s619_s9 }
  0x30   :  { %p626_p10 = por %p625_p9, %p624_p8 }
  0x32   :  { %p627_p11 = pnand %p626_p10, %p620_p7 }
  0x34   :  { %630 = shalt.err (!%p627_p11)
}
  0x35   :  { %s665_s0 = smov 64   ;;  %s666_s21 = smov 4  }
  0x36   :  { %50 = dma.hbm_to_vmem [thread:$0]  %s772_s3, 2048, %s45_s24, [#allocation6], %s665_s0, %s665_s0, %s666_s21  }
  0x37   :  { %653 = dma.done.wait [#allocation3], 256  }
  0x38   :  { %654 = vsyncadd [#allocation3], 4294967040 }
  0x39   :  { %655 = dma.done.wait [#allocation6], 4096  }
  0x3a   :  { %656 = vsyncadd [#allocation6], 4294963200  ;;  %v667_v0 = vmov 0   ;;  %v517_v1 = vld [vmem:[#allocation5 + $0x4] ss:$8 sps:$4 sm:$0xff]   ;;  %v63_v21 = vld [vmem:[#allocation2] sm:$0xff]  ;;  %v84_v36 = vlaneseq }
  0x3b   :  { %206 = vmatprep.mubr.bf16.mxu0 %v667_v0  ;;  %v519_v2 = vld [vmem:[#allocation5] ss:$8 sps:$4 sm:$0xff]   ;;  %174 = vmatprep.subr.bf16.mxu0 %v517_v1  ;;  %v520_v3 = vld [vmem:[#allocation5 + $0x14] ss:$8 sps:$4 sm:$0xff]   ;;  %v522_v4 = vld [vmem:[#allocation5 + $0x10] ss:$8 sps:$4 sm:$0xff]  }
  0x3c   :  { %175 = vmatpush1.bf16.msra.mxu0 %v519_v2  ;;  %v523_v5 = vld [vmem:[#allocation5 + $0x24] ss:$8 sps:$4 sm:$0xff]   ;;  %v525_v6 = vld [vmem:[#allocation5 + $0x20] ss:$8 sps:$4 sm:$0xff]   ;;  %v526_v7 = vld [vmem:[#allocation5 + $0x34] ss:$8 sps:$4 sm:$0xff]  }
  0x3d   :  { %176 = vmatprep.subr.bf16.mxu0 %v520_v3  ;;  %v528_v8 = vld [vmem:[#allocation5 + $0x30] ss:$8 sps:$4 sm:$0xff]   ;;  %v529_v9 = vld [vmem:[#allocation5 + $0x44] ss:$8 sps:$4 sm:$0xff]   ;;  %v531_v11 = vld [vmem:[#allocation5 + $0x40] ss:$8 sps:$4 sm:$0xff]  }
  0x3e   :  { %v541_v10 = vld [vmem:[#allocation7 + $0x40] sm:$0xff]   ;;  %v543_v13 = vld [vmem:[#allocation7 + $0x48] sm:$0xff]   ;;  %v532_v14 = vld [vmem:[#allocation5 + $0x54] ss:$8 sps:$4 sm:$0xff]   ;;  %v85_v37 = vshrl.u32 %v84_v36, 7  ;;  %s668_s12 = smov [#allocation8]  }
  0x3f   :  { %v542_v12 = vld [vmem:[#allocation7] sm:$0xff]   ;;  %485 = vmatprep.subr.bf16.mxu1 %v541_v10  ;;  %v544_v15 = vld [vmem:[#allocation7 + $0x8] sm:$0xff]   ;;  %v534_v16 = vld [vmem:[#allocation5 + $0x50] ss:$8 sps:$4 sm:$0xff]   ;;  %s430_s13 = sshll.u32 %s668_s12, 4  ;;  %s431_s13 = int_to_ptr.vmem [resolvable:$true] %s430_s13 }
  0x40   :  { %177 = vmatpush1.bf16.msra.mxu0 %v522_v4  ;;  %486 = vmatpush3.bf16.msra.mxu1 %v542_v12  ;;  %v535_v17 = vld [vmem:[#allocation5 + $0x64] ss:$8 sps:$4 sm:$0xff]   ;;  %v537_v18 = vld [vmem:[#allocation5 + $0x60] ss:$8 sps:$4 sm:$0xff]   ;;  %v538_v19 = vld [vmem:[#allocation5 + $0x74] ss:$8 sps:$4 sm:$0xff]   ;;  %p636_p13 = scmp.lt.s32.totalorder %s431_s13, %s431_s13 }
  0x41   :  { %178 = vmatprep.subr.bf16.mxu0 %v523_v5  ;;  %487 = vmatprep.subr.bf16.mxu1 %v543_v13  ;;  %v540_v20 = vld [vmem:[#allocation5 + $0x70] ss:$8 sps:$4 sm:$0xff]   ;;  %v549_v28 = vld [vmem:[#allocation7 + $0x60] sm:$0xff]   ;;  %v551_v30 = vld [vmem:[#allocation7 + $0x68] sm:$0xff]   ;;  %v86_v38 = vsub.s32 0, %v85_v37  ;;  %v90_v40 = vsub.s32 1, %v85_v37 }
  0x42   :  { %v64_v22 = vld [vmem:[#allocation2 + $0x8] sm:$0xff]  ;;  %v545_v24 = vld [vmem:[#allocation7 + $0x50] sm:$0xff]   ;;  %v550_v29 = vld [vmem:[#allocation7 + $0x20] sm:$0xff]   ;;  %s631_s14 = scalar_lea.vmem %s431_s13, 128 }
  0x43   :  { %v65_v23 = vpack.c.bf16 %v64_v22, %v63_v21  ;;  %v546_v25 = vld [vmem:[#allocation7 + $0x10] sm:$0xff]   ;;  %v547_v26 = vld [vmem:[#allocation7 + $0x58] sm:$0xff]   ;;  %v552_v31 = vld [vmem:[#allocation7 + $0x28] sm:$0xff]   ;;  %p632_p12 = scmp.ne.s32.totalorder %s431_s13, %s631_s14  ;;  %p637_p0 = scmp.lt.s32.totalorder %s631_s14, %s631_s14 }
  0x44   :  { %179 = vmatpush1.bf16.msra.mxu0 %v525_v6  ;;  %488 = vmatpush3.bf16.msra.mxu1 %v544_v15  ;;  %v548_v27 = vld [vmem:[#allocation7 + $0x18] sm:$0xff]   ;;  %v553_v32 = vld [vmem:[#allocation7 + $0x70] sm:$0xff]  }
  0x45   :  { %180 = vmatprep.subr.bf16.mxu0 %v526_v7  ;;  %489 = vmatprep.subr.bf16.mxu1 %v545_v24  ;;  %v554_v33 = vld [vmem:[#allocation7 + $0x30] sm:$0xff]   ;;  %v555_v34 = vld [vmem:[#allocation7 + $0x78] sm:$0xff]   ;;  %p638_p1 = por %p637_p0, %p636_p13 }
  0x46   :  { %v556_v35 = vld [vmem:[#allocation7 + $0x38] sm:$0xff]   ;;  %v82_v39 = vld [vmem:[%s771_s2] sm:$0x3] }
  0x47   :  { %v87_v41 = vrot.slane %v82_v39, %v86_v38  ;;  %v91_v42 = vrot.slane %v82_v39, %v90_v40  ;;  %v459_v13 = vld [vmem:[%s773_s4] ss:$0 sm:$0xff]  ;;  %p639_p2 = pnand %p638_p1, %p632_p12 }
  0x48   :  { %181 = vmatpush1.bf16.msra.mxu0 %v528_v8  ;;  %490 = vmatpush3.bf16.msra.mxu1 %v546_v25 }
  0x49   :  { %182 = vmatprep.subr.bf16.mxu0 %v529_v9  ;;  %491 = vmatprep.subr.bf16.mxu1 %v547_v26 }
  0x4c   :  { %183 = vmatpush1.bf16.msra.mxu0 %v531_v11  ;;  %492 = vmatpush3.bf16.msra.mxu1 %v548_v27 }
  0x4d   :  { %184 = vmatprep.subr.bf16.mxu0 %v532_v14  ;;  %493 = vmatprep.subr.bf16.mxu1 %v549_v28 }
  0x50   :  { %185 = vmatpush1.bf16.msra.mxu0 %v534_v16  ;;  %494 = vmatpush3.bf16.msra.mxu1 %v550_v29 }
  0x51   :  { %186 = vmatprep.subr.bf16.mxu0 %v535_v17  ;;  %495 = vmatprep.subr.bf16.mxu1 %v551_v30 }
  0x54   :  { %187 = vmatpush1.bf16.msra.mxu0 %v537_v18  ;;  %496 = vmatpush3.bf16.msra.mxu1 %v552_v31 }
  0x55   :  { %188 = vmatprep.subr.bf16.mxu0 %v538_v19  ;;  %497 = vmatprep.subr.bf16.mxu1 %v553_v32 }
  0x58   :  { %189 = vmatpush1.bf16.msra.mxu0 %v540_v20  ;;  %498 = vmatpush3.bf16.msra.mxu1 %v554_v33 }
  0x59   :  { %499 = vmatprep.subr.bf16.mxu1 %v555_v34 }
  0x5b   :  { %207 = vmatmul.mubr.bf16.vlgmr.msra.gmra.mrb[0].mxu0 %v65_v23 }
  0x5c   :  { %500 = vmatpush3.bf16.msra.mxu1 %v556_v35 }
 0x12e   :  { %v208_v43 = vpop.f32.mrb[0].mxu0 }
 0x12f   :  { %v209_v44 = vadd.f32 %v208_v43, %v87_v41  ;;  %v210_v45 = vpop.f32.mrb[1].mxu0 }
 0x130   :  { %v211_v46 = vadd.f32 %v210_v45, %v91_v42  ;;  %v212_v47 = vpop.f32.mrb[2].mxu0 }
 0x131   :  { %v221_v48 = vmul.f32 0.70710677, %v209_v44  ;;  %v213_v49 = vadd.f32 %v212_v47, %v87_v41  ;;  %v214_v50 = vpop.f32.mrb[3].mxu0  ;;  %v217_v61 = vmul.f32 0.5, %v209_v44 }
 0x132   :  { %v222_v51 = vmul.f32 0.70710677, %v211_v46  ;;  %v215_v52 = vadd.f32 %v214_v50, %v91_v42  ;;  %v218_v0 = vmul.f32 0.5, %v211_v46 }
 0x133   :  { %557 = verf.f32 %v221_v48  ;;  %v223_v53 = vmul.f32 0.70710677, %v213_v49  ;;  %v219_v62 = vmul.f32 0.5, %v213_v49 }
 0x134   :  { %559 = verf.f32 %v222_v51  ;;  %v224_v54 = vmul.f32 0.70710677, %v215_v52  ;;  %v220_v1 = vmul.f32 0.5, %v215_v52 }
 0x135   :  { %561 = verf.f32 %v223_v53 }
 0x136   :  { %563 = verf.f32 %v224_v54 }
 0x13d   :  { %v558_v55 = vpop.eup %557 }
 0x13e   :  { %v560_v56 = vpop.eup %559  ;;  %v229_v57 = vadd.f32 1.0, %v558_v55 }
 0x13f   :  { %v562_v58 = vpop.eup %561  ;;  %v230_v59 = vadd.f32 1.0, %v560_v56 }
 0x140   :  { %v564_v60 = vpop.eup %563  ;;  %v231_v63 = vadd.f32 1.0, %v562_v58  ;;  %v233_v3 = vmul.f32 %v229_v57, %v217_v61 }
 0x141   :  { %v232_v2 = vadd.f32 1.0, %v564_v60  ;;  %v234_v5 = vmul.f32 %v230_v59, %v218_v0 }
 0x142   :  { %v235_v4 = vmul.f32 %v231_v63, %v219_v62 }
 0x143   :  { %v236_v6 = vmul.f32 %v232_v2, %v220_v1 }
 0x144   :  { %v237_v7 = vpack.c.bf16 %v235_v4, %v233_v3 }
 0x145   :  { %v238_v8 = vpack.c.bf16 %v236_v6, %v234_v5 }
 0x147   :  { %406 = vmatprep.mubr.bf16.mxu1 %v238_v8 }
 0x148   :  { %407 = vmatmul.mubr.bf16.vlgmr.msra.gmra.mrb[0].mxu1 %v237_v7 }
 0x21b   :  { %v501_v9 = vpop.f32.mrb[0].mxu1 }
 0x21c   :  { %v502_v10 = vpop.f32.mrb[1].mxu1 }
 0x21d   :  { %v503_v11 = vadd.f32 %v502_v10, %v501_v9  ;;  %v504_v12 = vpop.f32.mrb[2].mxu1 }
 0x21e   :  { %v505_v14 = vpop.f32.mrb[3].mxu1 }
 0x21f   :  { %v506_v15 = vadd.f32 %v505_v14, %v504_v12  ;;  %v409_v16 = vadd.f32 %v503_v11, %v459_v13 }
 0x221   :  { %v412_v17 = vadd.f32 %v506_v15, %v459_v13 }
 0x223   :  { %v483_v18 = vpack.c.bf16 %v412_v17, %v409_v16 }
 0x225   :  { %484 = vst [vmem:[#allocation8] sm:$0xff] %v483_v18  }
 0x226   :  { %642 = shalt.err (!%p639_p2)
}
 0x227   :  { %s643_s4 = scalar_lea.hbm %s774_s5, 128 }
 0x228   :  { %p644_p3 = scmp.ne.s32.totalorder %s774_s5, %s643_s4  ;;  %p647_p4 = scmp.lt.u32.totalorder %s643_s4, %s774_s5 }
 0x22a   :  { %p649_p5 = pnand %p647_p4, %p644_p3 }
 0x22c   :  { %652 = shalt.err (!%p649_p5)
}
 0x22d   :  { %436 = dma.vmem_to_hbm [thread:$0]  %s431_s13, 128, %s774_s5, [#allocation4], %s665_s0, %s665_s0, %s666_s21  }
 0x22e   :  { %657 = dma.done.wait [#allocation4], 128  }
 0x22f   :  { %658 = vsyncadd [#allocation4], 4294967168 }
 0x230   :  { %440 = vsyncpa [#allocation3], 1 }
 0x231   :  { %441 = vsyncpa [#allocation6], 1 }
 0x232   :  { %442 = vsyncpa [#allocation4], 1 }

// kernel: tpu_custom_call.1
= control target key start
LH: loop header
LB: loop body
LE: loop exit
PB: predicated region body
PF: predicated region fallthrough
CT: control target
= control target key end

     0   :  { %10 = vsyncpa [#allocation3], 0  ;;  %s769_s0 = inlined_call_operand.hbm [shape: f32[16,1024], index: 0, kind: input, shape index: {}]   ;;  %s770_s1 = inlined_call_operand.hbm [shape: bf16[128,256], index: 1, kind: input, shape index: {}]   ;;  %s771_s2 = inlined_call_operand.vmem [shape: f32[1,256], index: 2, kind: input, shape index: {}]   ;;  %s772_s3 = inlined_call_operand.hbm [shape: bf16[256,128], index: 3, kind: input, shape index: {}]   ;;  %s773_s4 = inlined_call_operand.vmem [shape: f32[1,128], index: 4, kind: input, shape index: {}]   ;;  %s774_s5 = inlined_call_operand.hbm [shape: bf16[16,128], index: 5, kind: output, shape index: {}]  }
   0x1   :  { %11 = vsyncpa [#allocation6], 0 }
   0x2   :  { %12 = vsyncpa [#allocation4], 0  ;;  %s659_s18 = smov [#allocation5]   ;;  %s660_s20 = smov [#allocation2]  }
   0x3   :  { %s30_s19 = sshll.u32 %s659_s18, 4  ;;  %s18_s21 = sshll.u32 %s660_s20, 4  ;;  %s31_s19 = int_to_ptr.vmem [resolvable:$true] %s30_s19  ;;  %s699_s21 = int_to_ptr.vmem [resolvable:$true] %s18_s21 }
   0x4   :  { %s565_s24 = scalar_lea.hbm %s770_s1, 2048 }
   0x5   :  { %p566_p0 = scmp.ne.s32.totalorder %s770_s1, %s565_s24  ;;  %p569_p1 = scmp.lt.u32.totalorder %s565_s24, %s770_s1 }
   0x7   :  { %p571_p2 = pnand %p569_p1, %p566_p0 }
   0x9   :  { %574 = shalt.err (!%p571_p2)
}
   0xa   :  { %s575_s29 = scalar_lea.vmem %s31_s19, 2048  ;;  %p580_p4 = scmp.lt.s32.totalorder %s31_s19, %s31_s19 }
   0xb   :  { %p576_p3 = scmp.ne.s32.totalorder %s31_s19, %s575_s29  ;;  %p581_p5 = scmp.lt.s32.totalorder %s575_s29, %s575_s29 }
   0xd   :  { %p582_p6 = por %p581_p5, %p580_p4 }
   0xf   :  { %p583_p7 = pnand %p582_p6, %p576_p3 }
  0x11   :  { %586 = shalt.err (!%p583_p7)
}
  0x12   :  { %s661_s30 = smov 128   ;;  %s662_s6 = smov 8  }
  0x13   :  { %36 = dma.hbm_to_vmem [thread:$0]  %s770_s1, 2048, %s31_s19, [#allocation6], %s661_s30, %s661_s30, %s662_s6  }
  0x14   :  { %s587_s11 = scalar_lea.hbm %s769_s0, 256  ;;  %s589_s16 = scalar_lea.hbm %s769_s0, 2048 }
  0x15   :  { %p588_p8 = scmp.ne.s32.totalorder %s769_s0, %s587_s11  ;;  %p590_p9 = scmp.lt.u32.totalorder %s589_s16, %s587_s11 }
  0x16   :  { %p591_p10 = scmp.lt.u32.totalorder %s587_s11, %s769_s0 }
  0x18   :  { %p592_p11 = por %p591_p10, %p590_p9 }
  0x1a   :  { %p593_p12 = pnand %p592_p11, %p588_p8 }
  0x1c   :  { %596 = shalt.err (!%p593_p12)
}
  0x1d   :  { %s597_s1 = scalar_lea.vmem %s699_s21, 256  ;;  %p602_p0 = scmp.lt.s32.totalorder %s699_s21, %s699_s21 }
  0x1e   :  { %p598_p13 = scmp.ne.s32.totalorder %s699_s21, %s597_s1  ;;  %p603_p1 = scmp.lt.s32.totalorder %s597_s1, %s597_s1 }
  0x20   :  { %p604_p2 = por %p603_p1, %p602_p0 }
  0x22   :  { %p605_p3 = pnand %p604_p2, %p598_p13 }
  0x24   :  { %608 = shalt.err (!%p605_p3)
}
  0x25   :  { %s663_s19 = smov 1024   ;;  %s664_s23 = smov [#allocation7]  }
  0x26   :  { %24 = dma.hbm_to_vmem [thread:$0]  %s769_s0, 256, %s699_s21, [#allocation3], %s663_s19, %s661_s30, %s662_s6  }
  0x27   :  { %s44_s24 = sshll.u32 %s664_s23, 4  ;;  %s609_s27 = scalar_lea.hbm %s772_s3, 2048  ;;  %s45_s24 = int_to_ptr.vmem [resolvable:$true] %s44_s24 }
  0x28   :  { %p610_p4 = scmp.ne.s32.totalorder %s772_s3, %s609_s27  ;;  %p613_p5 = scmp.lt.u32.totalorder %s609_s27, %s772_s3 }
  0x2a   :  { %p615_p6 = pnand %p613_p5, %p610_p4 }
  0x2c   :  { %618 = shalt.err (!%p615_p6)
}
  0x2d   :  { %s619_s9 = scalar_lea.vmem %s45_s24, 2048  ;;  %p624_p8 = scmp.lt.s32.totalorder %s45_s24, %s45_s24 }
  0x2e   :  { %p620_p7 = scmp.ne.s32.totalorder %s45_s24, %s619_s9  ;;  %p625_p9 = scmp.lt.s32.totalorder %s619_s9, %s619_s9 }
  0x30   :  { %p626_p10 = por %p625_p9, %p624_p8 }
  0x32   :  { %p627_p11 = pnand %p626_p10, %p620_p7 }
  0x34   :  { %630 = shalt.err (!%p627_p11)
}
  0x35   :  { %s665_s0 = smov 64   ;;  %s666_s21 = smov 4  }
  0x36   :  { %50 = dma.hbm_to_vmem [thread:$0]  %s772_s3, 2048, %s45_s24, [#allocation6], %s665_s0, %s665_s0, %s666_s21  }
  0x37   :  { %653 = dma.done.wait [#allocation3], 256  }
  0x38   :  { %654 = vsyncadd [#allocation3], 4294967040 }
  0x39   :  { %655 = dma.done.wait [#allocation6], 4096  }
  0x3a   :  { %656 = vsyncadd [#allocation6], 4294963200  ;;  %v667_v0 = vmov 0   ;;  %v517_v1 = vld [vmem:[#allocation5 + $0x4] ss:$8 sps:$4 sm:$0xff]   ;;  %v63_v21 = vld [vmem:[#allocation2] sm:$0xff]  ;;  %v84_v36 = vlaneseq }
  0x3b   :  { %206 = vmatprep.mubr.bf16.mxu0 %v667_v0  ;;  %v519_v2 = vld [vmem:[#allocation5] ss:$8 sps:$4 sm:$0xff]   ;;  %174 = vmatprep.subr.bf16.mxu0 %v517_v1  ;;  %v520_v3 = vld [vmem:[#allocation5 + $0x14] ss:$8 sps:$4 sm:$0xff]   ;;  %v522_v4 = vld [vmem:[#allocation5 + $0x10] ss:$8 sps:$4 sm:$0xff]  }
  0x3c   :  { %175 = vmatpush1.bf16.msra.mxu0 %v519_v2  ;;  %v523_v5 = vld [vmem:[#allocation5 + $0x24] ss:$8 sps:$4 sm:$0xff]   ;;  %v525_v6 = vld [vmem:[#allocation5 + $0x20] ss:$8 sps:$4 sm:$0xff]   ;;  %v526_v7 = vld [vmem:[#allocation5 + $0x34] ss:$8 sps:$4 sm:$0xff]  }
  0x3d   :  { %176 = vmatprep.subr.bf16.mxu0 %v520_v3  ;;  %v528_v8 = vld [vmem:[#allocation5 + $0x30] ss:$8 sps:$4 sm:$0xff]   ;;  %v529_v9 = vld [vmem:[#allocation5 + $0x44] ss:$8 sps:$4 sm:$0xff]   ;;  %v531_v11 = vld [vmem:[#allocation5 + $0x40] ss:$8 sps:$4 sm:$0xff]  }
  0x3e   :  { %v541_v10 = vld [vmem:[#allocation7 + $0x40] sm:$0xff]   ;;  %v543_v13 = vld [vmem:[#allocation7 + $0x48] sm:$0xff]   ;;  %v532_v14 = vld [vmem:[#allocation5 + $0x54] ss:$8 sps:$4 sm:$0xff]   ;;  %v85_v37 = vshrl.u32 %v84_v36, 7  ;;  %s668_s12 = smov [#allocation8]  }
  0x3f   :  { %v542_v12 = vld [vmem:[#allocation7] sm:$0xff]   ;;  %485 = vmatprep.subr.bf16.mxu1 %v541_v10  ;;  %v544_v15 = vld [vmem:[#allocation7 + $0x8] sm:$0xff]   ;;  %v534_v16 = vld [vmem:[#allocation5 + $0x50] ss:$8 sps:$4 sm:$0xff]   ;;  %s430_s13 = sshll.u32 %s668_s12, 4  ;;  %s431_s13 = int_to_ptr.vmem [resolvable:$true] %s430_s13 }
  0x40   :  { %177 = vmatpush1.bf16.msra.mxu0 %v522_v4  ;;  %486 = vmatpush3.bf16.msra.mxu1 %v542_v12  ;;  %v535_v17 = vld [vmem:[#allocation5 + $0x64] ss:$8 sps:$4 sm:$0xff]   ;;  %v537_v18 = vld [vmem:[#allocation5 + $0x60] ss:$8 sps:$4 sm:$0xff]   ;;  %v538_v19 = vld [vmem:[#allocation5 + $0x74] ss:$8 sps:$4 sm:$0xff]   ;;  %p636_p13 = scmp.lt.s32.totalorder %s431_s13, %s431_s13 }
  0x41   :  { %178 = vmatprep.subr.bf16.mxu0 %v523_v5  ;;  %487 = vmatprep.subr.bf16.mxu1 %v543_v13  ;;  %v540_v20 = vld [vmem:[#allocation5 + $0x70] ss:$8 sps:$4 sm:$0xff]   ;;  %v549_v28 = vld [vmem:[#allocation7 + $0x60] sm:$0xff]   ;;  %v551_v30 = vld [vmem:[#allocation7 + $0x68] sm:$0xff]   ;;  %v86_v38 = vsub.s32 0, %v85_v37  ;;  %v90_v40 = vsub.s32 1, %v85_v37 }
  0x42   :  { %v64_v22 = vld [vmem:[#allocation2 + $0x8] sm:$0xff]  ;;  %v545_v24 = vld [vmem:[#allocation7 + $0x50] sm:$0xff]   ;;  %v550_v29 = vld [vmem:[#allocation7 + $0x20] sm:$0xff]   ;;  %s631_s14 = scalar_lea.vmem %s431_s13, 128 }
  0x43   :  { %v65_v23 = vpack.c.bf16 %v64_v22, %v63_v21  ;;  %v546_v25 = vld [vmem:[#allocation7 + $0x10] sm:$0xff]   ;;  %v547_v26 = vld [vmem:[#allocation7 + $0x58] sm:$0xff]   ;;  %v552_v31 = vld [vmem:[#allocation7 + $0x28] sm:$0xff]   ;;  %p632_p12 = scmp.ne.s32.totalorder %s431_s13, %s631_s14  ;;  %p637_p0 = scmp.lt.s32.totalorder %s631_s14, %s631_s14 }
  0x44   :  { %179 = vmatpush1.bf16.msra.mxu0 %v525_v6  ;;  %488 = vmatpush3.bf16.msra.mxu1 %v544_v15  ;;  %v548_v27 = vld [vmem:[#allocation7 + $0x18] sm:$0xff]   ;;  %v553_v32 = vld [vmem:[#allocation7 + $0x70] sm:$0xff]  }
  0x45   :  { %180 = vmatprep.subr.bf16.mxu0 %v526_v7  ;;  %489 = vmatprep.subr.bf16.mxu1 %v545_v24  ;;  %v554_v33 = vld [vmem:[#allocation7 + $0x30] sm:$0xff]   ;;  %v555_v34 = vld [vmem:[#allocation7 + $0x78] sm:$0xff]   ;;  %p638_p1 = por %p637_p0, %p636_p13 }
  0x46   :  { %v556_v35 = vld [vmem:[#allocation7 + $0x38] sm:$0xff]   ;;  %v82_v39 = vld [vmem:[%s771_s2] sm:$0x3] }
  0x47   :  { %v87_v41 = vrot.slane %v82_v39, %v86_v38  ;;  %v91_v42 = vrot.slane %v82_v39, %v90_v40  ;;  %v459_v13 = vld [vmem:[%s773_s4] ss:$0 sm:$0xff]  ;;  %p639_p2 = pnand %p638_p1, %p632_p12 }
  0x48   :  { %181 = vmatpush1.bf16.msra.mxu0 %v528_v8  ;;  %490 = vmatpush3.bf16.msra.mxu1 %v546_v25 }
  0x49   :  { %182 = vmatprep.subr.bf16.mxu0 %v529_v9  ;;  %491 = vmatprep.subr.bf16.mxu1 %v547_v26 }
  0x4c   :  { %183 = vmatpush1.bf16.msra.mxu0 %v531_v11  ;;  %492 = vmatpush3.bf16.msra.mxu1 %v548_v27 }
  0x4d   :  { %184 = vmatprep.subr.bf16.mxu0 %v532_v14  ;;  %493 = vmatprep.subr.bf16.mxu1 %v549_v28 }
  0x50   :  { %185 = vmatpush1.bf16.msra.mxu0 %v534_v16  ;;  %494 = vmatpush3.bf16.msra.mxu1 %v550_v29 }
  0x51   :  { %186 = vmatprep.subr.bf16.mxu0 %v535_v17  ;;  %495 = vmatprep.subr.bf16.mxu1 %v551_v30 }
  0x54   :  { %187 = vmatpush1.bf16.msra.mxu0 %v537_v18  ;;  %496 = vmatpush3.bf16.msra.mxu1 %v552_v31 }
  0x55   :  { %188 = vmatprep.subr.bf16.mxu0 %v538_v19  ;;  %497 = vmatprep.subr.bf16.mxu1 %v553_v32 }
  0x58   :  { %189 = vmatpush1.bf16.msra.mxu0 %v540_v20  ;;  %498 = vmatpush3.bf16.msra.mxu1 %v554_v33 }
  0x59   :  { %499 = vmatprep.subr.bf16.mxu1 %v555_v34 }
  0x5b   :  { %207 = vmatmul.mubr.bf16.vlgmr.msra.gmra.mrb[0].mxu0 %v65_v23 }
  0x5c   :  { %500 = vmatpush3.bf16.msra.mxu1 %v556_v35 }
 0x12e   :  { %v208_v43 = vpop.f32.mrb[0].mxu0 }
 0x12f   :  { %v209_v44 = vadd.f32 %v208_v43, %v87_v41  ;;  %v210_v45 = vpop.f32.mrb[1].mxu0 }
 0x130   :  { %v211_v46 = vadd.f32 %v210_v45, %v91_v42  ;;  %v212_v47 = vpop.f32.mrb[2].mxu0 }
 0x131   :  { %v221_v48 = vmul.f32 0.70710677, %v209_v44  ;;  %v213_v49 = vadd.f32 %v212_v47, %v87_v41  ;;  %v214_v50 = vpop.f32.mrb[3].mxu0  ;;  %v217_v61 = vmul.f32 0.5, %v209_v44 }
 0x132   :  { %v222_v51 = vmul.f32 0.70710677, %v211_v46  ;;  %v215_v52 = vadd.f32 %v214_v50, %v91_v42  ;;  %v218_v0 = vmul.f32 0.5, %v211_v46 }
 0x133   :  { %557 = verf.f32 %v221_v48  ;;  %v223_v53 = vmul.f32 0.70710677, %v213_v49  ;;  %v219_v62 = vmul.f32 0.5, %v213_v49 }
 0x134   :  { %559 = verf.f32 %v222_v51  ;;  %v224_v54 = vmul.f32 0.70710677, %v215_v52  ;;  %v220_v1 = vmul.f32 0.5, %v215_v52 }
 0x135   :  { %561 = verf.f32 %v223_v53 }
 0x136   :  { %563 = verf.f32 %v224_v54 }
 0x13d   :  { %v558_v55 = vpop.eup %557 }
 0x13e   :  { %v560_v56 = vpop.eup %559  ;;  %v229_v57 = vadd.f32 1.0, %v558_v55 }
 0x13f   :  { %v562_v58 = vpop.eup %561  ;;  %v230_v59 = vadd.f32 1.0, %v560_v56 }
 0x140   :  { %v564_v60 = vpop.eup %563  ;;  %v231_v63 = vadd.f32 1.0, %v562_v58  ;;  %v233_v3 = vmul.f32 %v229_v57, %v217_v61 }
 0x141   :  { %v232_v2 = vadd.f32 1.0, %v564_v60  ;;  %v234_v5 = vmul.f32 %v230_v59, %v218_v0 }
 0x142   :  { %v235_v4 = vmul.f32 %v231_v63, %v219_v62 }
 0x143   :  { %v236_v6 = vmul.f32 %v232_v2, %v220_v1 }
 0x144   :  { %v237_v7 = vpack.c.bf16 %v235_v4, %v233_v3 }
 0x145   :  { %v238_v8 = vpack.c.bf16 %v236_v6, %v234_v5 }
 0x147   :  { %406 = vmatprep.mubr.bf16.mxu1 %v238_v8 }
 0x148   :  { %407 = vmatmul.mubr.bf16.vlgmr.msra.gmra.mrb[0].mxu1 %v237_v7 }
 0x21b   :  { %v501_v9 = vpop.f32.mrb[0].mxu1 }
 0x21c   :  { %v502_v10 = vpop.f32.mrb[1].mxu1 }
 0x21d   :  { %v503_v11 = vadd.f32 %v502_v10, %v501_v9  ;;  %v504_v12 = vpop.f32.mrb[2].mxu1 }
 0x21e   :  { %v505_v14 = vpop.f32.mrb[3].mxu1 }
 0x21f   :  { %v506_v15 = vadd.f32 %v505_v14, %v504_v12  ;;  %v409_v16 = vadd.f32 %v503_v11, %v459_v13 }
 0x221   :  { %v412_v17 = vadd.f32 %v506_v15, %v459_v13 }
 0x223   :  { %v483_v18 = vpack.c.bf16 %v412_v17, %v409_v16 }
 0x225   :  { %484 = vst [vmem:[#allocation8] sm:$0xff] %v483_v18  }
 0x226   :  { %642 = shalt.err (!%p639_p2)
}
 0x227   :  { %s643_s4 = scalar_lea.hbm %s774_s5, 128 }
 0x228   :  { %p644_p3 = scmp.ne.s32.totalorder %s774_s5, %s643_s4  ;;  %p647_p4 = scmp.lt.u32.totalorder %s643_s4, %s774_s5 }
 0x22a   :  { %p649_p5 = pnand %p647_p4, %p644_p3 }
 0x22c   :  { %652 = shalt.err (!%p649_p5)
}
 0x22d   :  { %436 = dma.vmem_to_hbm [thread:$0]  %s431_s13, 128, %s774_s5, [#allocation4], %s665_s0, %s665_s0, %s666_s21  }
 0x22e   :  { %657 = dma.done.wait [#allocation4], 128  }
 0x22f   :  { %658 = vsyncadd [#allocation4], 4294967168 }
 0x230   :  { %440 = vsyncpa [#allocation3], 1 }
 0x231   :  { %441 = vsyncpa [#allocation6], 1 }
 0x232   :  { %442 = vsyncpa [#allocation4], 1 }

</bundles_post_ra>
